<compile_context>
chip_gen: v6e
topology: v6e:2x2x1
jax: 0.10.0
libtpu: 0.0.40
codegen_flags: <defaults>
</compile_context>

<pallas_src>
import jax
import jax.numpy as jnp
from jax import lax
from jax.experimental import pallas as pl
from jax.experimental.pallas import tpu as pltpu

LANES = 128
ACC_ROWS = 32                       # resident f32 accumulator: 4 independent vregs
MAX_STEP_BYTES = 8 * 1024 * 1024    # streamed bytes per grid step, summed over inputs
VMEM_LIMIT_BYTES = 32 * 1024 * 1024 # >= ~18 MiB double-buffered worst case; > v5e default


def _round_up(x, m):
    return ((x + m - 1) // m) * m


def _fold_add(acc_ref, tile, tile_rows):
    """Accumulate a (tile_rows, LANES) f32 tile onto the (ACC_ROWS, LANES) resident
    partial using only elementwise (VPU) adds -- no per-step cross-lane reduction."""
    full = (tile_rows // ACC_ROWS) * ACC_ROWS
    if full:
        acc_ref[...] += jnp.sum(
            tile[:full].reshape(full // ACC_ROWS, ACC_ROWS, LANES), axis=0)
    rem = tile_rows - full
    if rem:  # only reachable in the single-block (tile_rows == rows) configuration
        acc_ref[:rem, :] += tile[full:, :]


def _make_sum_kernel(tile_rows, rows, nb, nb0):
    """sum(|pred - target|) into per-core (ACC_ROWS, LANES) f32 partials."""
    need_tail = (rows % tile_rows) != 0   # last real block is partial
    need_oob = (2 * nb0) > nb             # odd block count: core 1 has a dummy step

    def kernel(p_ref, t_ref, s_ref):
        @pl.when(pl.program_id(1) == 0)
        def _():
            s_ref[...] = jnp.zeros_like(s_ref)

        gb = pl.program_id(0) * nb0 + pl.program_id(1)   # global row-block index

        def accumulate(mask_tail_rows):
            d = jnp.abs(p_ref[...].astype(jnp.float32) -
                        t_ref[...].astype(jnp.float32))
            if mask_tail_rows:
                row = lax.broadcasted_iota(jnp.int32, (tile_rows, LANES), 0)
                d = jnp.where(gb * tile_rows + row < rows, d, 0.0)
            _fold_add(s_ref, d, tile_rows)

        if need_tail or need_oob:
            full_cond = (gb < nb - 1) if need_tail else (gb < nb)

            @pl.when(full_cond)           # common path: no row-mask overhead
            def _():
                accumulate(False)

            if need_tail:
                @pl.when(gb == nb - 1)    # only the last real block pays for masking
                def _():
                    accumulate(True)
            # gb >= nb (duplicate step on the dummy core): accumulate nothing.
        else:
            accumulate(False)

    return kernel


def _make_masked_kernel(tile_rows, rows, nb, nb0, mask_is_float):
    """Masked sum(|pred - target|) and valid-element count partials."""
    need_tail = (rows % tile_rows) != 0
    need_oob = (2 * nb0) > nb

    def kernel(p_ref, t_ref, m_ref, s_ref, c_ref):
        @pl.when(pl.program_id(1) == 0)
        def _():
            s_ref[...] = jnp.zeros_like(s_ref)
            c_ref[...] = jnp.zeros_like(c_ref)

        gb = pl.program_id(0) * nb0 + pl.program_id(1)

        def accumulate(mask_tail_rows):
            p = p_ref[...].astype(jnp.float32)
            t = t_ref[...].astype(jnp.float32)
            m = m_ref[...]
            # PyTorch semantics: non-bool masks are thresholded with `> 0.5`.
            valid = (m > 0.5) if mask_is_float else (m > 0)
            if mask_tail_rows:
                row = lax.broadcasted_iota(jnp.int32, (tile_rows, LANES), 0)
                valid = jnp.logical_and(valid, gb * tile_rows + row < rows)
            # select (not multiply): out-of-bounds garbage may be NaN/Inf.
            d = jnp.where(valid, jnp.abs(p - t), 0.0)
            cnt = jnp.where(valid, 1.0, 0.0)
            _fold_add(s_ref, d, tile_rows)
            _fold_add(c_ref, cnt, tile_rows)

        if need_tail or need_oob:
            full_cond = (gb < nb - 1) if need_tail else (gb < nb)

            @pl.when(full_cond)
            def _():
                accumulate(False)

            if need_tail:
                @pl.when(gb == nb - 1)
                def _():
                    accumulate(True)
        else:
            accumulate(False)

    return kernel


def mae_loss(pred, target, mask=None):
    """Mean absolute error, optionally over mask==True elements only.

    Matches MAELoss.forward: mae = mean(|pred - target|[mask]); returns 0.0 if
    no valid elements remain after masking. Non-bool masks use `mask > 0.5`.
    """
    if pred.shape != target.shape:
        raise ValueError(f"Shape mismatch: pred {pred.shape}, target {target.shape}")
    if (not jnp.issubdtype(pred.dtype, jnp.floating)
            or not jnp.issubdtype(target.dtype, jnp.floating)):
        raise TypeError("Inputs must be floating-point tensors")
    if mask is not None and mask.shape != pred.shape:
        raise ValueError(f"Mask shape must match input shape: mask {mask.shape}")

    out_dtype = pred.dtype
    n = int(pred.size)
    if n == 0:
        return jnp.zeros((), dtype=out_dtype)

    p = pred.reshape(-1)       # row-major reshape: bitcast, no copy
    t = target.reshape(-1)

    m = None
    mask_is_float = False
    if mask is not None:
        m = mask.reshape(-1)   # native dtype: thresholding happens in-kernel
        if m.dtype == jnp.bool_:
            # TODO(synk): drop this cheap 1-byte/elt cast once bool VMEM blocks are
            # verified; float/int masks already stream with zero wrapper passes.
            m = m.astype(jnp.uint8)
        mask_is_float = bool(jnp.issubdtype(m.dtype, jnp.floating))

    aligned_n = (n // LANES) * LANES   # kernel handles the 128-aligned prefix
    rem_n = n - aligned_n              # <128 trailing elements handled in plain JAX

    kernel_sum = jnp.float32(0.0)
    kernel_cnt = jnp.float32(0.0)

    if aligned_n:
        rows = aligned_n // LANES
        # Aligned arrays pass through untouched; ragged arrays slice the prefix
        # (tiny remainder is summed in JAX below -- no whole-array pad copies).
        p2 = (p if rem_n == 0 else p[:aligned_n]).reshape(rows, LANES)
        t2 = (t if rem_n == 0 else t[:aligned_n]).reshape(rows, LANES)
        m2 = None
        if m is not None:
            m2 = (m if rem_n == 0 else m[:aligned_n]).reshape(rows, LANES)

        # Tile sizing by bytes (amortize the ~0.35us/step overhead).  Multiple of
        # 32 rows keeps the u8-mask tiling and the ACC_ROWS fold legal when grid>1.
        bytes_per_row = LANES * (p2.dtype.itemsize + t2.dtype.itemsize
                                 + (m2.dtype.itemsize if m2 is not None else 0))
        max_rows = max(ACC_ROWS,
                       (MAX_STEP_BYTES // bytes_per_row) // ACC_ROWS * ACC_ROWS)
        if rows <= 64:
            tile_rows = rows   # single full-dims block (exempt from (8,128) tiling)
        else:
            tile_rows = min(max_rows, _round_up(-(-rows // 2), ACC_ROWS))

        nb = -(-rows // tile_rows)   # total row-blocks
        nb0 = -(-nb // 2)            # row-blocks per core (leading "parallel" axis)
        grid = (2, nb0)

        def in_map(c, i):
            # Clamp so the dummy step on an odd block count stays in-bounds; the
            # kernel skips accumulation for it.
            return (jnp.minimum(c * nb0 + i, nb - 1), 0)

        in_spec = pl.BlockSpec((tile_rows, LANES), in_map)
        acc_spec = pl.BlockSpec((None, ACC_ROWS, LANES), lambda c, i: (c, 0, 0))
        acc_shape = jax.ShapeDtypeStruct((2, ACC_ROWS, LANES), jnp.float32)
        cparams = pltpu.CompilerParams(
            dimension_semantics=("parallel", "arbitrary"),
            vmem_limit_bytes=VMEM_LIMIT_BYTES)
        acc_bytes = 2 * ACC_ROWS * LANES * 4

        if m2 is None:
            s = pl.pallas_call(
                _make_sum_kernel(tile_rows, rows, nb, nb0),
                out_shape=acc_shape,
                grid_spec=pltpu.PrefetchScalarGridSpec(
                    num_scalar_prefetch=0, grid=grid,
                    in_specs=[in_spec, in_spec], out_specs=acc_spec),
                compiler_params=cparams,
                cost_estimate=pl.CostEstimate(
                    flops=3 * aligned_n, transcendentals=0,
                    bytes_accessed=int(aligned_n * (p2.dtype.itemsize
                                                    + t2.dtype.itemsize) + acc_bytes)),
            )(p2, t2)
            kernel_sum = jnp.sum(s)
        else:
            s, c = pl.pallas_call(
                _make_masked_kernel(tile_rows, rows, nb, nb0, mask_is_float),
                out_shape=(acc_shape, acc_shape),
                grid_spec=pltpu.PrefetchScalarGridSpec(
                    num_scalar_prefetch=0, grid=grid,
                    in_specs=[in_spec, in_spec, in_spec],
                    out_specs=(acc_spec, acc_spec)),
                compiler_params=cparams,
                cost_estimate=pl.CostEstimate(
                    flops=5 * aligned_n, transcendentals=0,
                    bytes_accessed=int(aligned_n * (p2.dtype.itemsize + t2.dtype.itemsize
                                                    + m2.dtype.itemsize) + 2 * acc_bytes)),
            )(p2, t2, m2)
            kernel_sum = jnp.sum(s)
            kernel_cnt = jnp.sum(c)

    # Ragged remainder (<128 elements): trivial plain-JAX work.
    rem_sum = jnp.float32(0.0)
    rem_cnt = jnp.float32(0.0)
    if rem_n:
        dr = jnp.abs(p[aligned_n:].astype(jnp.float32)
                     - t[aligned_n:].astype(jnp.float32))
        if m is not None:
            mr = m[aligned_n:]
            vr = (mr > 0.5) if mask_is_float else (mr > 0)
            rem_sum = jnp.sum(jnp.where(vr, dr, 0.0))
            rem_cnt = jnp.sum(vr.astype(jnp.float32))
        else:
            rem_sum = jnp.sum(dr)

    if m is None:
        mae = (kernel_sum + rem_sum) / jnp.float32(n)
    else:
        total = kernel_sum + rem_sum
        count = kernel_cnt + rem_cnt
        mae = jnp.where(count > 0, total / jnp.maximum(count, 1.0), jnp.float32(0.0))
    return mae.astype(out_dtype)


if __name__ == "__main__":
    key = jax.random.PRNGKey(0)
    keys = jax.random.split(key, 9)

    # Case 1: small NCHW image batch, unmasked + bool-masked (single-block path).
    pred = jax.random.normal(keys[0], (2, 4, 16, 16), dtype=jnp.float32)
    target = jax.random.normal(keys[1], (2, 4, 16, 16), dtype=jnp.float32)
    mask = jax.random.uniform(keys[2], (2, 4, 16, 16)) > 0.3

    out = mae_loss(pred, target)
    jax.block_until_ready(out)
    ref = jnp.mean(jnp.abs(pred - target))
    assert jnp.allclose(out, ref, atol=1e-5), (out, ref)

    out_m = mae_loss(pred, target, mask)
    jax.block_until_ready(out_m)
    mf = mask.astype(jnp.float32)
    ref_m = jnp.sum(jnp.abs(pred - target) * mf) / jnp.sum(mf)
    assert jnp.allclose(out_m, ref_m, atol=1e-5), (out_m, ref_m)

    # Case 2: ragged size (not a multiple of 128) with a float-valued mask
    # (exercises the aligned-prefix kernel + plain-JAX remainder, no pad copies).
    pr = jax.random.normal(keys[3], (5157,), dtype=jnp.float32)
    tr = jax.random.normal(keys[4], (5157,), dtype=jnp.float32)
    mr = jax.random.uniform(keys[5], (5157,))
    out_r = mae_loss(pr, tr)
    jax.block_until_ready(out_r)
    ref_r = jnp.mean(jnp.abs(pr - tr))
    assert jnp.allclose(out_r, ref_r, atol=1e-5), (out_r, ref_r)

    out_rm = mae_loss(pr, tr, mr)
    jax.block_until_ready(out_rm)
    mrf = (mr > 0.5).astype(jnp.float32)
    ref_rm = jnp.sum(jnp.abs(pr - tr) * mrf) / jnp.sum(mrf)
    assert jnp.allclose(out_rm, ref_rm, atol=1e-5), (out_rm, ref_rm)

    # Case 3: bf16 inputs streamed natively, f32 on-chip accumulation.
    pb = pred.astype(jnp.bfloat16)
    tb = target.astype(jnp.bfloat16)
    out_b = mae_loss(pb, tb)
    jax.block_until_ready(out_b)
    ref_b = jnp.mean(jnp.abs(pb.astype(jnp.float32) - tb.astype(jnp.float32)))
    assert jnp.allclose(out_b.astype(jnp.float32), ref_b, rtol=1e-2, atol=1e-2), (out_b, ref_b)

    # Case 4: medium array exercising grid > 1, the two-core block split, and the
    # pl.when-gated partial-last-block masking (900 rows -> 2 blocks of 480).
    p4 = jax.random.normal(keys[6], (3, 4, 96, 100), dtype=jnp.float32)
    t4 = jax.random.normal(keys[7], (3, 4, 96, 100), dtype=jnp.float32)
    m4 = jax.random.uniform(keys[8], (3, 4, 96, 100))
    out_g = mae_loss(p4, t4)
    jax.block_until_ready(out_g)
    ref_g = jnp.mean(jnp.abs(p4 - t4))
    assert jnp.allclose(out_g, ref_g, atol=1e-5), (out_g, ref_g)

    out_gm = mae_loss(p4, t4, m4)
    jax.block_until_ready(out_gm)
    m4f = (m4 > 0.5).astype(jnp.float32)
    ref_gm = jnp.sum(jnp.abs(p4 - t4) * m4f) / jnp.sum(m4f)
    assert jnp.allclose(out_gm, ref_gm, atol=1e-5), (out_gm, ref_gm)

    print("KERNEL_OK")
</pallas_src>

<mosaic_0001>
module attributes {stable_mosaic.version = 11 : i64} {
  func.func @kernel(%arg0: i32, %arg1: i32, %arg2: memref<16x128xf32, #tpu.memory_space<vmem>>, %arg3: memref<16x128xf32, #tpu.memory_space<vmem>>, %arg4: memref<1x32x128xf32, #tpu.memory_space<vmem>>) attributes {dimension_semantics = [#tpu.dimension_semantics<parallel>, #tpu.dimension_semantics<arbitrary>], iteration_bounds = array<i64: 2, 1>, scalar_prefetch = 0 : i64, scratch_operands = 0 : i64, tpu.core_type = #tpu.core_type<tc>, window_params = [{transform_indices = @transform_0, window_bounds = array<i64: 16, 128>}, {transform_indices = @transform_1, window_bounds = array<i64: 16, 128>}, {transform_indices = @transform_2, window_bounds = array<i64: 1, 32, 128>}]} {
    %c0_i32 = arith.constant 0 : i32
    %0 = arith.cmpi eq, %arg1, %c0_i32 : i32
    %1 = arith.extui %0 : i1 to i32
    %c0_i32_0 = arith.constant 0 : i32
    %2 = arith.cmpi ne, %1, %c0_i32_0 : i32
    scf.if %2 {
      %cst = arith.constant 0.000000e+00 : f32
      %8 = vector.broadcast %cst : f32 to vector<32x128xf32>
      %c0 = arith.constant 0 : index
      %c0_3 = arith.constant 0 : index
      %c0_4 = arith.constant 0 : index
      %9 = vector.load %arg4[%c0, %c0_3, %c0_4] : memref<1x32x128xf32, #tpu.memory_space<vmem>>, vector<1x32x128xf32>
      %10 = vector.shape_cast %9 : vector<1x32x128xf32> to vector<32x128xf32>
      %11 = vector.shape_cast %8 : vector<32x128xf32> to vector<1x32x128xf32>
      tpu.vector_store %arg4[%c0, %c0_3, %c0_4], %11 {strides = array<i32>} : memref<1x32x128xf32, #tpu.memory_space<vmem>>, vector<1x32x128xf32>,
    } else {
    }
    %c1_i32 = arith.constant 1 : i32
    %3 = arith.muli %arg0, %c1_i32 : i32
    %4 = arith.addi %3, %arg1 : i32
    %c1_i32_1 = arith.constant 1 : i32
    %5 = arith.cmpi slt, %4, %c1_i32_1 : i32
    %6 = arith.extui %5 : i1 to i32
    %c0_i32_2 = arith.constant 0 : i32
    %7 = arith.cmpi ne, %6, %c0_i32_2 : i32
    scf.if %7 {
      %c0 = arith.constant 0 : index
      %c0_3 = arith.constant 0 : index
      %8 = vector.load %arg2[%c0, %c0_3] : memref<16x128xf32, #tpu.memory_space<vmem>>, vector<16x128xf32>
      %c0_4 = arith.constant 0 : index
      %c0_5 = arith.constant 0 : index
      %9 = vector.load %arg3[%c0_4, %c0_5] : memref<16x128xf32, #tpu.memory_space<vmem>>, vector<16x128xf32>
      %10 = arith.subf %8, %9 : vector<16x128xf32>
      %11 = math.absf %10 : vector<16x128xf32>
      %c0_6 = arith.constant 0 : index
      %c0_7 = arith.constant 0 : index
      %c0_8 = arith.constant 0 : index
      %12 = vector.load %arg4[%c0_6, %c0_7, %c0_8] : memref<1x32x128xf32, #tpu.memory_space<vmem>>, vector<1x16x128xf32>
      %13 = vector.shape_cast %12 : vector<1x16x128xf32> to vector<16x128xf32>
      %14 = arith.addf %13, %11 : vector<16x128xf32>
      %c0_9 = arith.constant 0 : index
      %c0_10 = arith.constant 0 : index
      %c0_11 = arith.constant 0 : index
      %15 = vector.load %arg4[%c0_9, %c0_10, %c0_11] : memref<1x32x128xf32, #tpu.memory_space<vmem>>, vector<1x16x128xf32>
      %16 = vector.shape_cast %15 : vector<1x16x128xf32> to vector<16x128xf32>
      %17 = vector.shape_cast %14 : vector<16x128xf32> to vector<1x16x128xf32>
      tpu.vector_store %arg4[%c0_9, %c0_10, %c0_11], %17 {strides = array<i32>} : memref<1x32x128xf32, #tpu.memory_space<vmem>>, vector<1x16x128xf32>,
    } else {
    }
    return
  }
  func.func @transform_0(%arg0: i32, %arg1: i32) -> (i32, i32) {
    %c1_i32 = arith.constant 1 : i32
    %0 = arith.muli %arg0, %c1_i32 : i32
    %1 = arith.addi %0, %arg1 : i32
    %c0_i32 = arith.constant 0 : i32
    %2 = arith.minsi %1, %c0_i32 : i32
    %c0_i32_0 = arith.constant 0 : i32
    %c0_i32_1 = arith.constant 0 : i32
    return %2, %c0_i32_0 : i32, i32
  }
  func.func @transform_1(%arg0: i32, %arg1: i32) -> (i32, i32) {
    %c1_i32 = arith.constant 1 : i32
    %0 = arith.muli %arg0, %c1_i32 : i32
    %1 = arith.addi %0, %arg1 : i32
    %c0_i32 = arith.constant 0 : i32
    %2 = arith.minsi %1, %c0_i32 : i32
    %c0_i32_0 = arith.constant 0 : i32
    %c0_i32_1 = arith.constant 0 : i32
    return %2, %c0_i32_0 : i32, i32
  }
  func.func @transform_2(%arg0: i32, %arg1: i32) -> (i32, i32, i32) {
    %c0_i32 = arith.constant 0 : i32
    %c0_i32_0 = arith.constant 0 : i32
    %c0_i32_1 = arith.constant 0 : i32
    return %arg0, %c0_i32, %c0_i32_0 : i32, i32, i32
  }
}

</mosaic_0001>

<bundles_post_ra>
// kernel: tpu_custom_call.1
= control target key start
LH: loop header
LB: loop body
LE: loop exit
PB: predicated region body
PF: predicated region fallthrough
CT: control target
= control target key end

     0   :  { %7 = vsyncpa [#allocation3], 0  ;;  %s884_s0 = inlined_call_operand.hbm [shape: f32[16,128], index: 0, kind: input, shape index: {}]   ;;  %s885_s1 = inlined_call_operand.hbm [shape: f32[16,128], index: 1, kind: input, shape index: {}]   ;;  %s886_s2 = inlined_call_operand.hbm [shape: f32[2,32,128], index: 2, kind: output, shape index: {}]  }
   0x1   :  { %9 = vsyncpa [#allocation3 + $0x1], 0 }
   0x2   :  { %10 = vsyncpa [#allocation6], 0 }
   0x3   :  { %12 = vsyncpa [#allocation6 + $0x1], 0 }
   0x4   :  { %13 = vsyncpa [#allocation4], 0 }
   0x5   :  { %15 = vsyncpa [#allocation4 + $0x1], 0  ;;  %s690_s9 = smov 0   ;;  %s692_s10 = smov 0  }
   0x6   :  { %s694_s11 = smov 0   ;;  %s696_s12 = smov 0  }
   0x7   :  { %s698_s13 = smov 0   ;;  %s700_s14 = smov 0  }
   0x8   :  { %s702_s15 = smov 0   ;;  %s704_s16 = smov 0  }
   0x9 LB: > { %s385_s17 = sadd.s32 4294967295, %s665_s16   ;;  %s386_s18 = sadd.s32 4294967294, %s665_s16   ;;  %s665_s16 = sphi %s704_s16, %s21_s16   ;;  %s661_s15 = sphi %s702_s15, %s905_s15   ;;  %s657_s14 = sphi %s700_s14, %s904_s14   ;;  %s653_s13 = sphi %s698_s13, %s874_s13   ;;  %s649_s12 = sphi %s696_s12, %s903_s12   ;;  %s645_s11 = sphi %s694_s11, %s902_s11   ;;  %s641_s10 = sphi %s692_s10, %s901_s10   ;;  %s637_s9 = sphi %s690_s9, %s900_s9  }
   0xa   : > { %s33_s19 = sadd.s32 1, %s661_s15  ;;  %p634_p1 = scmp.ne.s32.totalorder %s653_s13, 0 }
   0xb   : > { %p35_p0 = scmp.ge.s32.totalorder %s33_s19, 2  ;;  %p54_p2 = scmp.eq.s32.totalorder %s665_s16, 0 }
   0xc   : > { %p59_p3 = scmp.ne.s32.totalorder %s653_s13, %s649_s12  ;;  %p60_p5 = scmp.eq.s32.totalorder %s385_s17, 0 }
   0xd   : > { %s907_s19 = smov (%p35_p0, %s33_s19), 0  ;;  %p736_p4 = por %p634_p1, %p54_p2 }
   0xe   : > { %p740_p6 = por %p60_p5, %p59_p3  ;;  %s101_s22 = ssub.s32 %s661_s15, %s907_s19 }
   0xf   : > { %p102_p7 = scmp.eq.s32.totalorder %s101_s22, 0  ;;  %s104_s23 = sadd.s32 1, %s645_s11 }
  0x10   : > { %s890_s21 = scalar_select %p740_p6, 1, 0 }
  0x11   : > { %s748_s24 = scalar_select %p102_p7, %s645_s11, %s104_s23  }
  0x12   : > { %p114_p8 = scmp.ne.s32.totalorder %s645_s11, %s641_s10  ;;  %p115_p9 = scmp.eq.s32.totalorder %s385_s17, 1 }
  0x13   : > { %p120_p10 = scmp.ne.s32.totalorder %s641_s10, %s637_s9  ;;  %p121_p11 = scmp.eq.s32.totalorder %s386_s18, 1 }
  0x14   : > { %p754_p12 = por %p115_p9, %p114_p8  ;;  %p425_p1 = scmp.lt.s32.totalorder %s665_s16, 2 }
  0x15   : > { %p759_p0 = por %p121_p11, %p120_p10  ;;  %s667_s27 = smov [#allocation2]  }
  0x16   : > { %s891_s25 = scalar_select %p754_p12, 1, 0 }
  0x17   : > { %s892_s26 = scalar_select %p759_p0, 1, 0 }
  0x18   : > { %s155_s28 = sshll.u32 %s667_s27, 4  ;;  %p766_p2 = pnand %p425_p1, %p736_p4  ;;  %s156_s28 = int_to_ptr.vmem [resolvable:$true] %s155_s28 }
  0x19   : > { %s504_s4 = scalar_lea.hbm %s884_s0, 256 }
  0x1a   : > { %p505_p3 = scmp.ne.s32.totalorder %s884_s0, %s504_s4  ;;  %p506_p5 = pneg %p766_p2 }
  0x1b   : > { %p511_p8 = scmp.lt.s32.totalorder %s504_s4, %s504_s4 }
  0x1c   : > { %p507_p7 = pnand %p506_p5, %p505_p3 }
  0x1e   : > { %p508_p4 = pneg %p507_p7 }
  0x20   : > { %p513_p9 = pnand %p511_p8, %p508_p4 }
  0x22   : > { %516 = shalt.err (!%p513_p9)
}
  0x23   : > { %s517_s7 = scalar_lea.vmem %s156_s28, 256  ;;  %s524_s8 = scalar_lea.vmem %s156_s28, 512 }
  0x24   : > { %p518_p10 = scmp.ne.s32.totalorder %s156_s28, %s517_s7  ;;  %p525_p13 = scmp.lt.s32.totalorder %s156_s28, %s156_s28 }
  0x25   : > { %p526_p0 = scmp.lt.s32.totalorder %s524_s8, %s517_s7 }
  0x26   : > { %p520_p11 = pnand %p518_p10, %p506_p5 }
  0x27   : > { %p527_p12 = por %p526_p0, %p525_p13 }
  0x28   : > { %p521_p1 = pneg %p520_p11 }
  0x2a   : > { %p528_p6 = pnand %p527_p12, %p521_p1 }
  0x2c   : > { %531 = shalt.err (!%p528_p6)
}
  0x2d   : > { %s668_s12 = smov 128   ;;  %s669_s17 = smov 8  }
  0x2e   : > { %417 = dma.hbm_to_vmem [thread:$0]  (!%p766_p2), %s884_s0, 256, %s156_s28, [#allocation3], %s668_s12, %s668_s12, %s669_s17  }
  0x2f   : > { %p395_p3 = scmp.ge.s32.totalorder %s665_s16, 1  ;;  %p187_p7 = scmp.lt.s32.totalorder %s665_s16, 3 }
  0x30   : > { %s670_s23 = smov [#allocation5]   ;;  %s532_s4 = scalar_lea.hbm %s885_s1, 256 }
  0x31   : > { %p791_p4 = pnand %p395_p3, %p187_p7  ;;  %s179_s27 = sshll.u32 %s670_s23, 4  ;;  %s180_s27 = int_to_ptr.vmem [resolvable:$true] %s179_s27 }
  0x32   : > { %p533_p6 = scmp.ne.s32.totalorder %s885_s1, %s532_s4  ;;  %p539_p0 = scmp.lt.s32.totalorder %s532_s4, %s532_s4 }
  0x33   : > { %s894_s22 = scalar_select %p791_p4, 1, 0 }
  0x34   : > { %p535_p12 = pnand %p533_p6, %p506_p5 }
  0x36   : > { %p536_p13 = pneg %p535_p12 }
  0x38   : > { %p541_p8 = pnand %p539_p0, %p536_p13 }
  0x3a   : > { %544 = shalt.err (!%p541_p8)
}
  0x3b   : > { %s545_s28 = scalar_lea.vmem %s180_s27, 256  ;;  %s552_s7 = scalar_lea.vmem %s180_s27, 512 }
  0x3c   : > { %p546_p9 = scmp.ne.s32.totalorder %s180_s27, %s545_s28  ;;  %p553_p1 = scmp.lt.s32.totalorder %s180_s27, %s180_s27 }
  0x3d   : > { %p554_p3 = scmp.lt.s32.totalorder %s552_s7, %s545_s28 }
  0x3e   : > { %p548_p10 = pnand %p546_p9, %p506_p5 }
  0x3f   : > { %p555_p7 = por %p554_p3, %p553_p1 }
  0x40   : > { %p549_p11 = pneg %p548_p10 }
  0x42   : > { %p556_p4 = pnand %p555_p7, %p549_p11 }
  0x44   : > { %559 = shalt.err (!%p556_p4)
}
  0x45   : > { %420 = dma.hbm_to_vmem [thread:$0]  (!%p766_p2), %s885_s1, 256, %s180_s27, [#allocation6], %s668_s12, %s668_s12, %s669_s17  }
  0x46   : > { %p895_p6 = scmp.ne.s32.totalorder %s894_s22, 0 }
  0x47   : > { %s193_s20 = sand.u32 (!%p895_p6), 1, %s653_s13   ;;  %p896_p5 = scmp.ne.s32.totalorder (!%p895_p6), %s890_s21, 0 }
  0x48   : > { %191 = sbr.rel (%p895_p6) target bundleno = 121 (0x79), region = 28  ;;  %s396_s23 = sshll.u32 (!%p895_p6), %s193_s20, 4 }
  0x49   : > { %s194_s30 = scalar_lea.sflag (!%p895_p6), [#allocation3], %s193_s20  ;;  %s197_s3 = scalar_lea.vmem (!%p895_p6), [#allocation2], %s396_s23 }
  0x4d   : > { %623 = dma.done.wait (%p896_p5), %s194_s30, 256  }
  0x4e   : > { %625 = vsyncadd (%p896_p5), %s194_s30, 4294967040  ;;  %s203_s29 = scalar_lea.sflag [#allocation6], %s193_s20  ;;  %s206_s4 = scalar_lea.vmem [#allocation5], %s396_s23 }
  0x4f   : > { %627 = dma.done.wait (%p896_p5), %s203_s29, 256  }
  0x50   : > { %629 = vsyncadd (%p896_p5), %s203_s29, 4294967040  ;;  %s229_s12 = sand.u32 1, %s641_s10   ;;  %v671_v0 = vmov 0.0   ;;  %p399_p2 = scmp.ge.s32.totalorder %s657_s14, 1 }
  0x51   : > { %s398_s17 = sshll.u32 %s229_s12, 5 }
  0x52   : > { %s231_s22 = scalar_lea.vmem [#allocation7], %s398_s17  ;;  %252 = sbr.rel (%p399_p2) target bundleno = 96 (0x60), region = 44 }
  0x53   : > { %244 = vst [vmem:[%s231_s22] sm:$0xff] %v671_v0  ;;  %245 = vst [vmem:[%s231_s22 + $0x8] sm:$0xff] %v671_v0 }
  0x54   : > { %246 = vst [vmem:[%s231_s22 + $0x10] sm:$0xff] %v671_v0  ;;  %247 = vst [vmem:[%s231_s22 + $0x18] sm:$0xff] %v671_v0 }
  0x57   : > { %v253_v1 = vld [vmem:[%s197_s3] sm:$0xff]  ;;  %v254_v4 = vld [vmem:[%s197_s3 + $0x8] sm:$0xff] }
  0x58   : > { %v255_v2 = vld [vmem:[%s206_s4] sm:$0xff]  ;;  %v256_v5 = vld [vmem:[%s206_s4 + $0x8] sm:$0xff] }
  0x59   : > { %v257_v3 = vsub.f32 %v253_v1, %v255_v2  ;;  %v258_v7 = vsub.f32 %v254_v4, %v256_v5 }
  0x5a   : > { %v261_v6 = vld [vmem:[%s231_s22] sm:$0xff]  ;;  %v262_v9 = vld [vmem:[%s231_s22 + $0x8] sm:$0xff] }
  0x5b   : > { %v259_v8 = vand.u32 2147483647, %v257_v3  ;;  %v260_v10 = vand.u32 2147483647, %v258_v7 }
  0x5d   : > { %v263_v11 = vadd.f32 %v261_v6, %v259_v8  ;;  %v264_v12 = vadd.f32 %v262_v9, %v260_v10 }
  0x5f   : > { %265 = vst [vmem:[%s231_s22] sm:$0xff] %v263_v11  ;;  %266 = vst [vmem:[%s231_s22 + $0x8] sm:$0xff] %v264_v12 }
  0x60 PF: > { %s407_s21 = sshll.u32 %s657_s14, 9  ;;  %s281_s28 = sshll.u32 %s231_s22, 4  ;;  %s831_s28 = int_to_ptr.vmem [resolvable:$true] %s281_s28 }
  0x61   : > { %s829_s6 = scalar_lea.hbm %s886_s2, %s407_s21  ;;  %s833_s7 = scalar_lea.sflag [#allocation4], %s229_s12 }
  0x62   : > { %s560_s8 = scalar_lea.vmem %s831_s28, 512  ;;  %p897_p12 = scmp.ne.s32.totalorder %s891_s25, 0 }
  0x63   : > { %p561_p4 = scmp.ne.s32.totalorder %s831_s28, %s560_s8  ;;  %s672_s18 = smov [#allocation7]  }
  0x64   : > { %s564_s14 = sshll.u32 %s672_s18, 4  ;;  %s565_s14 = int_to_ptr.vmem [resolvable:$false] %s564_s14 }
  0x65   : > { %p562_p13 = pnand %p561_p4, %p897_p12  ;;  %s566_s20 = scalar_lea.vmem %s565_s14, 1024 }
  0x66   : > { %p567_p8 = scmp.lt.s32.totalorder %s831_s28, %s565_s14  ;;  %p568_p9 = scmp.lt.s32.totalorder %s566_s20, %s560_s8 }
  0x67   : > { %p563_p0 = pneg %p562_p13 }
  0x68   : > { %p569_p10 = por %p568_p9, %p567_p8 }
  0x6a   : > { %p570_p11 = pnand %p569_p10, %p563_p0 }
  0x6c   : > { %573 = shalt.err (!%p570_p11)
}
  0x6d   : > { %s574_s23 = scalar_lea.hbm %s829_s6, 512  ;;  %s578_s29 = scalar_lea.hbm %s886_s2, 1024 }
  0x6e   : > { %p575_p1 = scmp.ne.s32.totalorder %s829_s6, %s574_s23  ;;  %p579_p6 = scmp.lt.s32.totalorder %s829_s6, %s886_s2 }
  0x6f   : > { %p580_p5 = scmp.lt.s32.totalorder %s578_s29, %s574_s23 }
  0x70   : > { %p576_p3 = pnand %p575_p1, %p897_p12 }
  0x71   : > { %p581_p2 = por %p580_p5, %p579_p6 }
  0x72   : > { %p577_p7 = pneg %p576_p3 }
  0x74   : > { %p582_p4 = pnand %p581_p2, %p577_p7 }
  0x76   : > { %585 = shalt.err (!%p582_p4)
}
  0x77   : > { %s673_s17 = smov 128   ;;  %s674_s22 = smov 8  }
  0x78   : > { %412 = dma.vmem_to_hbm [thread:$0]  (%p897_p12), %s831_s28, 512, %s829_s6, %s833_s7, %s673_s17, %s673_s17, %s674_s22  }
  0x79 PF: > { %s296_s21 = sand.u32 1, %s637_s9   ;;  %p898_p13 = scmp.ne.s32.totalorder %s892_s26, 0 }
  0x7a   : > { %p899_p0 = scmp.ge.s32.totalorder %s665_s16, 2  ;;  %s297_s27 = scalar_lea.sflag [#allocation4], %s296_s21 }
  0x7c   : > { %p422_p8 = pnand %p899_p0, %p898_p13 }
  0x7e   : > { %p423_p9 = pneg %p422_p8 }
  0x80   : > { %631 = dma.done.wait (%p423_p9), %s297_s27, 512  }
  0x81   : > { %633 = vsyncadd (%p423_p9), %s297_s27, 4294966784  ;;  %s21_s16 = sadd.s32 1, %s665_s16   ;;  %s900_s9 = smov %s641_s10 }
  0x82   : > { %p18_p10 = scmp.ge.s32.totalorder %s21_s16, 4   ;;  %s901_s10 = smov %s645_s11 }
  0x83   : > { %s902_s11 = smov %s748_s24  ;;  %s903_s12 = smov %s653_s13 }
  0x84   : > { %s874_s13 = smov 0   ;;  %s904_s14 = smov %s661_s15 }
  0x85   : > { %s905_s15 = smov %s907_s19  ;;  %20 = sbr.rel (!%p18_p10) target bundleno = 9 (0x9), region = 94 }
  0x8a   :  { %302 = vsyncpa [#allocation3], 1 }
  0x8b   :  { %304 = vsyncpa [#allocation3 + $0x1], 1 }
  0x8c   :  { %305 = vsyncpa [#allocation6], 1 }
  0x8d   :  { %307 = vsyncpa [#allocation6 + $0x1], 1 }
  0x8e   :  { %308 = vsyncpa [#allocation4], 1 }
  0x8f   :  { %310 = vsyncpa [#allocation4 + $0x1], 1 }

</bundles_post_ra>
